<compile_context>
chip_gen: v7x
topology: tpu7x:2x2x1
jax: 0.10.0
libtpu: 0.0.40
codegen_flags: <defaults>
</compile_context>

<pallas_src>
import jax
import jax.numpy as jnp
from jax.experimental import pallas as pl
from jax.experimental.pallas import tpu as pltpu


def _neg_pearson_kernel(preds_ref, labels_ref, pearson_ref):
    # One (block_b, T) tile per grid step; all reductions are per-row, so the
    # garbage rows of a partial last block never contaminate valid rows.
    x = preds_ref[...].astype(jnp.float32)
    y = labels_ref[...].astype(jnp.float32)
    inv_n = jnp.float32(1.0 / x.shape[1])  # num_elements = preds.shape[1]

    # Pass 1: per-row means.
    mean_x = jnp.sum(x, axis=1, keepdims=True) * inv_n
    mean_y = jnp.sum(y, axis=1, keepdims=True) * inv_n

    # Pass 2: centered second moments (numerically stable Pearson).
    xc = x - mean_x
    yc = y - mean_y
    cov = jnp.sum(xc * yc, axis=1, keepdims=True)
    var_x = jnp.sum(xc * xc, axis=1, keepdims=True)
    var_y = jnp.sum(yc * yc, axis=1, keepdims=True)

    denom_sq = var_x * var_y  # >= 0 up to rounding; clamp for safety.
    denom_sq = jnp.maximum(denom_sq, 0.0)
    # PyTorch: denominator == 0 -> pearson = 0.  Double-where keeps rsqrt fed
    # with a safe value (and rsqrt is one EUP op vs sqrt + divide).
    safe_denom = jnp.where(denom_sq <= 0.0, 1.0, denom_sq)
    pearson = jnp.where(denom_sq <= 0.0, 0.0, cov * jax.lax.rsqrt(safe_denom))

    pearson_ref[...] = pearson


def _round_up(x: int, m: int) -> int:
    return ((x + m - 1) // m) * m


def _choose_block_b(B: int, T: int) -> int:
    # Cap the on-chip f32 working set per input block at ~2 MiB regardless of
    # the input dtype (bf16 inputs are promoted on-chip, so sizing by itemsize
    # would double vreg/VMEM pressure).  Streaming plateaus near the HBM
    # roofline by ~1 MiB tiles, so larger blocks buy nothing.
    f32_cap_bytes = 2 * 1024 * 1024
    max_rows = max(8, ((f32_cap_bytes // max(1, T * 4)) // 8) * 8)
    block_b = B if B <= max_rows else max_rows
    # v7x has 2 TensorCores: force >= 2 grid steps once the batch is big enough
    # to split on 8-row sublane boundaries, so the "parallel" axis shards.
    if B >= 16:
        block_b = min(block_b, _round_up(pl.cdiv(B, 2), 8))
    return block_b


def negative_pearson_loss(preds: jax.Array, labels: jax.Array, *, block_b: int | None = None) -> jax.Array:
    """preds, labels: (B, T) arrays (any float dtype). Returns scalar f32 loss."""
    assert preds.shape == labels.shape and preds.ndim == 2
    B, T = preds.shape

    if block_b is None:
        block_b = _choose_block_b(B, T)

    grid_steps = pl.cdiv(B, block_b)
    grid = (grid_steps,)

    # Triple-buffer inputs only when the grid is long enough to benefit; the
    # extra buffer at <= 2 MiB/block still fits comfortably in scoped VMEM.
    if grid_steps >= 3:
        in_spec = pl.BlockSpec((block_b, T), lambda i: (i, 0), pipeline_mode=pl.Buffered(3))
    else:
        in_spec = pl.BlockSpec((block_b, T), lambda i: (i, 0))

    pearson = pl.pallas_call(
        _neg_pearson_kernel,
        out_shape=jax.ShapeDtypeStruct((B, 1), jnp.float32),
        grid_spec=pltpu.PrefetchScalarGridSpec(
            num_scalar_prefetch=0,
            grid=grid,
            in_specs=[in_spec, in_spec],
            # Narrow (block_b, 1) output is fine: it is ~T x smaller than the
            # input stream; no transpose / lane-densification needed.
            out_specs=pl.BlockSpec((block_b, 1), lambda i: (i, 0)),
        ),
        compiler_params=pltpu.CompilerParams(
            dimension_semantics=("parallel",),
            # Explicit scoped-VMEM limit: covers 2 inputs x <=3 buffers x <=2 MiB
            # (native dtype) plus f32 promotion temporaries, and lifts v5e's
            # 16 MiB default.  Well under physical VMEM on v5e/v6e (128 MiB)
            # and v7x (64 MiB).
            vmem_limit_bytes=32 * 1024 * 1024,
        ),
    )(preds, labels)  # native dtype in; f32 promotion happens on-chip

    # Tiny (B,) mean in the wrapper — keeps grid steps independent / parallel
    # and is correct for partial last blocks (OOB output rows are discarded).
    return jnp.mean(1.0 - pearson[:, 0])


def _reference(preds, labels):
    # Pure-JAX reference mirroring the PyTorch loop (vectorized over batch).
    x = preds.astype(jnp.float32)
    y = labels.astype(jnp.float32)
    n = jnp.float32(x.shape[1])
    sx = jnp.sum(x, axis=1)
    sy = jnp.sum(y, axis=1)
    sxy = jnp.sum(x * y, axis=1)
    sx2 = jnp.sum(x * x, axis=1)
    sy2 = jnp.sum(y * y, axis=1)
    num = n * sxy - sx * sy
    den_sq = (n * sx2 - sx * sx) * (n * sy2 - sy * sy)
    den = jnp.sqrt(jnp.maximum(den_sq, 0.0))
    pearson = jnp.where(den <= 0.0, 0.0, num / den)
    return jnp.mean(1.0 - pearson)


if __name__ == "__main__":
    key = jax.random.PRNGKey(0)
    k1, k2, k3, k4 = jax.random.split(key, 4)

    # Test 1: small rPPG-style shape (matches the original module usage).
    B, T = 2, 160
    preds = jax.random.normal(k1, (B, T), dtype=jnp.float32)
    labels = 0.7 * preds + 0.3 * jax.random.normal(k2, (B, T), dtype=jnp.float32)
    loss = negative_pearson_loss(preds, labels)
    jax.block_until_ready(loss)
    ref = _reference(preds, labels)
    assert jnp.allclose(loss, ref, atol=2e-5), (loss, ref)

    # Test 2: batch-tiled path with a partial last block and the Buffered(3)
    # input pipeline (B=20, block_b=8 -> grid 3).
    B2, T2 = 20, 160
    preds2 = jax.random.normal(k3, (B2, T2), dtype=jnp.float32)
    labels2 = 0.5 * preds2 + 0.5 * jax.random.normal(k4, (B2, T2), dtype=jnp.float32)
    loss2 = negative_pearson_loss(preds2, labels2, block_b=8)
    jax.block_until_ready(loss2)
    ref2 = _reference(preds2, labels2)
    assert jnp.allclose(loss2, ref2, atol=2e-5), (loss2, ref2)

    # Test 3: bf16 inputs go straight into the kernel (no wrapper cast);
    # auto heuristic forces a 2-step grid (B=20 >= 16 -> block_b=16).
    preds_bf = preds2.astype(jnp.bfloat16)
    labels_bf = labels2.astype(jnp.bfloat16)
    loss_bf = negative_pearson_loss(preds_bf, labels_bf)
    jax.block_until_ready(loss_bf)
    ref_bf = _reference(preds_bf, labels_bf)
    assert jnp.allclose(loss_bf, ref_bf, atol=1e-4), (loss_bf, ref_bf)

    print("KERNEL_OK")
</pallas_src>

<mosaic_0001>
module attributes {stable_mosaic.version = 11 : i64} {
  func.func @_neg_pearson_kernel(%arg0: i32, %arg1: memref<2x160xf32, #tpu.memory_space<vmem>>, %arg2: memref<2x160xf32, #tpu.memory_space<vmem>>, %arg3: memref<2x1xf32, #tpu.memory_space<vmem>>) attributes {dimension_semantics = [#tpu.dimension_semantics<parallel>], iteration_bounds = array<i64: 1>, scalar_prefetch = 0 : i64, scratch_operands = 0 : i64, tpu.core_type = #tpu.core_type<tc>, window_params = [{transform_indices = @transform_0, window_bounds = array<i64: 2, 160>}, {transform_indices = @transform_1, window_bounds = array<i64: 2, 160>}, {transform_indices = @transform_2, window_bounds = array<i64: 2, 1>}]} {
    %c0 = arith.constant 0 : index
    %c0_0 = arith.constant 0 : index
    %0 = vector.load %arg1[%c0, %c0_0] : memref<2x160xf32, #tpu.memory_space<vmem>>, vector<2x160xf32>
    %c0_1 = arith.constant 0 : index
    %c0_2 = arith.constant 0 : index
    %1 = vector.load %arg2[%c0_1, %c0_2] : memref<2x160xf32, #tpu.memory_space<vmem>>, vector<2x160xf32>
    %cst = arith.constant dense<0.000000e+00> : vector<2xf32>
    %2 = vector.multi_reduction <add>, %0, %cst [1] : vector<2x160xf32> to vector<2xf32>
    %3 = vector.shape_cast %2 : vector<2xf32> to vector<2x1xf32>
    %cst_3 = arith.constant 6.250000e-03 : f32
    %4 = vector.broadcast %cst_3 : f32 to vector<2x1xf32>
    %5 = arith.mulf %3, %4 : vector<2x1xf32>
    %cst_4 = arith.constant dense<0.000000e+00> : vector<2xf32>
    %6 = vector.multi_reduction <add>, %1, %cst_4 [1] : vector<2x160xf32> to vector<2xf32>
    %7 = vector.shape_cast %6 : vector<2xf32> to vector<2x1xf32>
    %cst_5 = arith.constant 6.250000e-03 : f32
    %8 = vector.broadcast %cst_5 : f32 to vector<2x1xf32>
    %9 = arith.mulf %7, %8 : vector<2x1xf32>
    %10 = vector.broadcast %5 : vector<2x1xf32> to vector<2x160xf32>
    %11 = arith.subf %0, %10 : vector<2x160xf32>
    %12 = vector.broadcast %9 : vector<2x1xf32> to vector<2x160xf32>
    %13 = arith.subf %1, %12 : vector<2x160xf32>
    %14 = arith.mulf %11, %13 : vector<2x160xf32>
    %cst_6 = arith.constant dense<0.000000e+00> : vector<2xf32>
    %15 = vector.multi_reduction <add>, %14, %cst_6 [1] : vector<2x160xf32> to vector<2xf32>
    %16 = vector.shape_cast %15 : vector<2xf32> to vector<2x1xf32>
    %17 = arith.mulf %11, %11 : vector<2x160xf32>
    %cst_7 = arith.constant dense<0.000000e+00> : vector<2xf32>
    %18 = vector.multi_reduction <add>, %17, %cst_7 [1] : vector<2x160xf32> to vector<2xf32>
    %19 = vector.shape_cast %18 : vector<2xf32> to vector<2x1xf32>
    %20 = arith.mulf %13, %13 : vector<2x160xf32>
    %cst_8 = arith.constant dense<0.000000e+00> : vector<2xf32>
    %21 = vector.multi_reduction <add>, %20, %cst_8 [1] : vector<2x160xf32> to vector<2xf32>
    %22 = vector.shape_cast %21 : vector<2xf32> to vector<2x1xf32>
    %23 = arith.mulf %19, %22 : vector<2x1xf32>
    %cst_9 = arith.constant 0.000000e+00 : f32
    %24 = vector.broadcast %cst_9 : f32 to vector<2x1xf32>
    %25 = arith.maximumf %23, %24 : vector<2x1xf32>
    %cst_10 = arith.constant 0.000000e+00 : f32
    %26 = vector.broadcast %cst_10 : f32 to vector<2x1xf32>
    %27 = arith.cmpf ole, %25, %26 : vector<2x1xf32>
    %cst_11 = arith.constant 1.000000e+00 : f32
    %28 = vector.broadcast %cst_11 : f32 to vector<2x1xf32>
    %29 = arith.select %27, %28, %25 : vector<2x1xi1>, vector<2x1xf32>
    %cst_12 = arith.constant 0.000000e+00 : f32
    %30 = vector.broadcast %cst_12 : f32 to vector<2x1xf32>
    %31 = arith.cmpf ole, %25, %30 : vector<2x1xf32>
    %32 = math.rsqrt %29 : vector<2x1xf32>
    %33 = arith.mulf %16, %32 : vector<2x1xf32>
    %cst_13 = arith.constant 0.000000e+00 : f32
    %34 = vector.broadcast %cst_13 : f32 to vector<2x1xf32>
    %35 = arith.select %31, %34, %33 : vector<2x1xi1>, vector<2x1xf32>
    %c0_14 = arith.constant 0 : index
    %c0_15 = arith.constant 0 : index
    %36 = vector.load %arg3[%c0_14, %c0_15] : memref<2x1xf32, #tpu.memory_space<vmem>>, vector<2x1xf32>
    tpu.vector_store %arg3[%c0_14, %c0_15], %35 {strides = array<i32>} : memref<2x1xf32, #tpu.memory_space<vmem>>, vector<2x1xf32>,
    return
  }
  func.func @transform_0(%arg0: i32) -> (i32, i32) {
    %c0_i32 = arith.constant 0 : i32
    %c0_i32_0 = arith.constant 0 : i32
    return %arg0, %c0_i32 : i32, i32
  }
  func.func @transform_1(%arg0: i32) -> (i32, i32) {
    %c0_i32 = arith.constant 0 : i32
    %c0_i32_0 = arith.constant 0 : i32
    return %arg0, %c0_i32 : i32, i32
  }
  func.func @transform_2(%arg0: i32) -> (i32, i32) {
    %c0_i32 = arith.constant 0 : i32
    %c0_i32_0 = arith.constant 0 : i32
    return %arg0, %c0_i32 : i32, i32
  }
}

</mosaic_0001>

<bundles_post_ra>
// kernel: tpu_custom_call.1
= control target key start
LH: loop header
LB: loop body
LE: loop exit
PB: predicated region body
PF: predicated region fallthrough
CT: control target
= control target key end

     0   :  { %7 = vsyncpa [#allocation3], 0  ;;  %s269_s0 = inlined_call_operand.hbm [shape: f32[2,160], index: 0, kind: input, shape index: {}]   ;;  %s270_s1 = inlined_call_operand.hbm [shape: f32[2,160], index: 1, kind: input, shape index: {}]   ;;  %s271_s2 = inlined_call_operand.vmem [shape: f32[2,1], index: 2, kind: output, shape index: {}]  }
   0x1   :  { %8 = vsyncpa [#allocation5], 0  ;;  %s213_s9 = smov [#allocation2]   ;;  %s214_s11 = smov [#allocation4]  }
   0x2   :  { %s15_s10 = sshll.u32 %s213_s9, 4  ;;  %s25_s12 = sshll.u32 %s214_s11, 4  ;;  %s16_s10 = int_to_ptr.vmem [resolvable:$true] %s15_s10  ;;  %s26_s12 = int_to_ptr.vmem [resolvable:$true] %s25_s12 }
   0x3   :  { %s165_s15 = scalar_lea.hbm %s269_s0, 64 }
   0x4   :  { %p166_p0 = scmp.ne.s32.totalorder %s269_s0, %s165_s15  ;;  %p169_p1 = scmp.lt.u32.totalorder %s165_s15, %s269_s0 }
   0x6   :  { %p171_p2 = pnand %p169_p1, %p166_p0 }
   0x8   :  { %174 = shalt.err (!%p171_p2)
}
   0x9   :  { %s175_s20 = scalar_lea.vmem %s16_s10, 64  ;;  %p180_p4 = scmp.lt.s32.totalorder %s16_s10, %s16_s10 }
   0xa   :  { %p176_p3 = scmp.ne.s32.totalorder %s16_s10, %s175_s20  ;;  %p181_p5 = scmp.lt.s32.totalorder %s175_s20, %s175_s20 }
   0xc   :  { %p182_p6 = por %p181_p5, %p180_p4 }
   0xe   :  { %p183_p7 = pnand %p182_p6, %p176_p3 }
  0x10   :  { %186 = shalt.err (!%p183_p7)
}
  0x11   :  { %18 = dma.hbm_to_vmem [thread:$0]  %s269_s0, 64, %s16_s10, [#allocation3]  }
  0x12   :  { %s187_s25 = scalar_lea.hbm %s270_s1, 64 }
  0x13   :  { %p188_p8 = scmp.ne.s32.totalorder %s270_s1, %s187_s25  ;;  %p191_p9 = scmp.lt.u32.totalorder %s187_s25, %s270_s1 }
  0x15   :  { %p193_p10 = pnand %p191_p9, %p188_p8 }
  0x17   :  { %196 = shalt.err (!%p193_p10)
}
  0x18   :  { %s197_s30 = scalar_lea.vmem %s26_s12, 64  ;;  %p202_p12 = scmp.lt.s32.totalorder %s26_s12, %s26_s12 }
  0x19   :  { %p198_p11 = scmp.ne.s32.totalorder %s26_s12, %s197_s30  ;;  %p203_p13 = scmp.lt.s32.totalorder %s197_s30, %s197_s30 }
  0x1b   :  { %p204_p0 = por %p203_p13, %p202_p12 }
  0x1d   :  { %p205_p1 = pnand %p204_p0, %p198_p11 }
  0x1f   :  { %208 = shalt.err (!%p205_p1)
}
  0x20   :  { %28 = dma.hbm_to_vmem [thread:$0]  %s270_s1, 64, %s26_s12, [#allocation5]  }
  0x21   :  { %209 = dma.done.wait [#allocation3], 64  }
  0x22   :  { %210 = vsyncadd [#allocation3], 4294967232 }
  0x23   :  { %211 = dma.done.wait [#allocation5], 64  }
  0x24   :  { %212 = vsyncadd [#allocation5], 4294967232  ;;  %v41_v0 = vlaneseq  ;;  %v215_v1 = vmov 1983009808   ;;  %v35_v6 = vld [vmem:[#allocation2] sm:$0xf] }
  0x25   :  { %v39_v2 = vunpack.c.l.s4 %v215_v1  ;;  %vm48_vm0 = vcmask 1041408   ;;  %v36_v7 = vld [vmem:[#allocation4] sm:$0xf]  ;;  %vm50_vm1 = vcmask 254976   ;;  %v216_v18 = vmov 269488144  }
  0x26   :  { %v42_v3 = vshrl.u32 %v41_v0, 7  ;;  %v75_v19 = vunpack.c.l.s4 %v216_v18  ;;  %vm151_vm3 = vcmask 1024  }
  0x27   :  { %v40_v4 = vunpack.c.0.s8 %v39_v2 }
  0x28   :  { %v76_v20 = vunpack.c.0.s8 %v75_v19 }
  0x29   :  { %v43_v5 = vsub.s32 %v40_v4, %v42_v3 }
  0x2a   :  { %v79_v21 = vsub.s32 %v76_v20, %v42_v3 }
  0x2b   :  { %v44_v8 = vrot.slane %v35_v6, %v43_v5  ;;  %v63_v9 = vrot.slane %v36_v7, %v43_v5 }
  0x2d   :  { %v45_v10 = vcombine.high %v44_v8, %v44_v8  ;;  %v49_v11 = vsel %vm48_vm0, %v44_v8, 0.0  ;;  %v64_v12 = vcombine.high %v63_v9, %v63_v9  ;;  %v67_v14 = vsel %vm48_vm0, %v63_v9, 0.0 }
  0x2f   :  { %v51_v13 = vsel %vm50_vm1, %v45_v10, 0.0  ;;  %v68_v15 = vsel %vm50_vm1, %v64_v12, 0.0 }
  0x30   :  { %v52_v16 = vadd.f32 %v51_v13, %v49_v11  ;;  %v69_v17 = vadd.f32 %v68_v15, %v67_v14 }
  0x32   :  { %53 = vadd.xlane.f32.xlu0 %v52_v16 }
  0x36   :  { %70 = vadd.xlane.f32.xlu0 %v69_v17 }
  0xbf   :  { %v54_v22 = vpop.xlane.xlu0 %53 }
  0xc0   :  { %v55_v23 = vmul.f32 0.00625, %v54_v22 }
  0xc2   :  { %v80_v24 = vrot.slane %v55_v23, %v79_v21 }
  0xc3   :  { %v71_v25 = vpop.xlane.xlu0 %70 }
  0xc4   :  { %v82_v26 = vsub.f32 %v35_v6, %v80_v24  ;;  %v72_v27 = vmul.f32 0.00625, %v71_v25 }
  0xc6   :  { %v90_v28 = vrot.slane %v72_v27, %v79_v21  ;;  %v110_v29 = vmul.f32 %v82_v26, %v82_v26 }
  0xc8   :  { %v92_v30 = vsub.f32 %v36_v7, %v90_v28  ;;  %v118_v31 = vrot.slane %v110_v29, %v43_v5 }
  0xca   :  { %v119_v32 = vcombine.high %v118_v31, %v118_v31  ;;  %v127_v33 = vmul.f32 %v92_v30, %v92_v30  ;;  %v93_v34 = vmul.f32 %v92_v30, %v82_v26  ;;  %v122_v35 = vsel %vm48_vm0, %v118_v31, 0.0 }
  0xcc   :  { %v123_v36 = vsel %vm50_vm1, %v119_v32, 0.0  ;;  %v135_v37 = vrot.slane %v127_v33, %v43_v5  ;;  %v101_v38 = vrot.slane %v93_v34, %v43_v5 }
  0xcd   :  { %v124_v39 = vadd.f32 %v123_v36, %v122_v35 }
  0xce   :  { %v136_v40 = vcombine.high %v135_v37, %v135_v37  ;;  %v102_v41 = vcombine.high %v101_v38, %v101_v38  ;;  %v139_v42 = vsel %vm48_vm0, %v135_v37, 0.0  ;;  %v105_v44 = vsel %vm48_vm0, %v101_v38, 0.0 }
  0xcf   :  { %125 = vadd.xlane.f32.xlu1 %v124_v39 }
  0xd0   :  { %v140_v43 = vsel %vm50_vm1, %v136_v40, 0.0  ;;  %v106_v45 = vsel %vm50_vm1, %v102_v41, 0.0 }
  0xd1   :  { %v141_v46 = vadd.f32 %v140_v43, %v139_v42  ;;  %v107_v47 = vadd.f32 %v106_v45, %v105_v44 }
  0xd3   :  { %142 = vadd.xlane.f32.xlu1 %v141_v46  ;;  %108 = vadd.xlane.f32.xlu0 %v107_v47 }
 0x15c   :  { %v126_v48 = vpop.xlane.xlu1 %125 }
 0x160   :  { %v143_v49 = vpop.xlane.xlu1 %142  ;;  %v109_v54 = vpop.xlane.xlu0 %108 }
 0x161   :  { %v144_v50 = vmul.f32 %v143_v49, %v126_v48 }
 0x163   :  { %v145_v51 = vmax.f32 %v144_v50, 0.0 }
 0x165   :  { %vm146_vm2 = vcmp.le.f32.partialorder %v145_v51, 0.0 }
 0x166   :  { %v147_v52 = vsel %vm146_vm2, 1.0, %v145_v51 }
 0x167   :  { %163 = vrsqrt.f32 %v147_v52 }
 0x171   :  { %v164_v53 = vpop.eup %163 }
 0x172   :  { %v149_v55 = vmul.f32 %v164_v53, %v109_v54 }
 0x174   :  { %v150_v56 = vsel %vm146_vm2, 0.0, %v149_v55 }
 0x175   :  { %152 = vst.msk [vmem:[%s271_s2] sm:$0x3] %vm151_vm3, %v150_v56 }
 0x176   :  { %157 = vsyncpa [#allocation3], 1 }
 0x177   :  { %158 = vsyncpa [#allocation5], 1 }

</bundles_post_ra>
